<compile_context>
chip_gen: v6e
topology: v6e:2x2x1
jax: 0.10.0
libtpu: 0.0.40
codegen_flags: <defaults>
</compile_context>

<pallas_src>
import functools

import jax
import jax.numpy as jnp
from jax.experimental import pallas as pl
from jax.experimental.pallas import tpu as pltpu

GAMMA = 0.1
BETA = 1.0
THETA = 3.0

_LANE = 128      # lane width: last-dim padding multiple
_M_TILE = 128    # batch-tile rows per grid step (>=128 to keep the MXU fed)


def _round_up(x, m):
    return ((x + m - 1) // m) * m


def _pad2d(x, rows, cols):
    r, c = x.shape
    return jnp.pad(x, ((0, rows - r), (0, cols - c)))


def _rho(z):
    # gamma * softplus(beta * (z - theta)), numerically stable, in f32.
    t = BETA * (z - THETA)
    return GAMMA * (jnp.maximum(t, 0.0) + jnp.log1p(jnp.exp(-jnp.abs(t))))


def _make_fused_kernel(n_layers):
    """Kernel over one (tm, D0) batch tile; chains n_layers matmul+rho in VMEM."""

    def kernel(*refs):
        x_ref = refs[0]
        w_refs = refs[1:1 + n_layers]
        o_ref = refs[1 + n_layers]

        # bf16 operands feed the MXU at peak rate; accumulation stays f32.
        a = x_ref[...].astype(jnp.bfloat16)
        act = None
        for li, w_ref in enumerate(w_refs):
            z = jnp.dot(a, w_ref[...], preferred_element_type=jnp.float32)
            act = _rho(z)                      # f32 epilogue
            if li + 1 < n_layers:
                a = act.astype(jnp.bfloat16)   # next layer's MXU operand
        o_ref[...] = act.astype(o_ref.dtype)

    return kernel


def prepare_params(weights, k_tab):
    """One-time weight prep, hoisted off the per-forward path.

    Folds k_i into W_i (rho(k*(a@W)) == rho(a@(k*W))), zero-pads both dims to
    lane multiples, and casts to bf16 for the MXU.
    """
    assert len(weights) == len(k_tab) and len(weights) >= 1
    dims = [weights[0].shape[0]] + [w.shape[1] for w in weights]
    dims_p = [_round_up(d, _LANE) for d in dims]
    w_p = []
    for i, (w, k) in enumerate(zip(weights, k_tab)):
        wk = jnp.float32(k) * w.astype(jnp.float32)
        w_p.append(_pad2d(wk, dims_p[i], dims_p[i + 1]).astype(jnp.bfloat16))
    return tuple(w_p), tuple(dims), tuple(dims_p)


def _vmem_limit_bytes(dims_p, tm):
    n = len(dims_p) - 1
    w_bytes = sum(dims_p[i] * dims_p[i + 1] * 2 for i in range(n))   # bf16 resident
    io_bytes = tm * dims_p[0] * 4 + tm * dims_p[-1] * 4              # x / out tiles
    act_bytes = 2 * tm * max(dims_p) * 4                             # in-kernel temps
    est = 2 * (w_bytes + io_bytes) + act_bytes + (4 << 20)           # 2x: double buffers
    # TODO(synk): v7x has 64 MiB/core VMEM; re-derive this cap per generation.
    return int(min(max(est, 16 << 20), 100 << 20))


def teacher_net_forward(x, w_padded, dims, dims_p, *, tm=_M_TILE):
    """teacherNet forward as a single fused, batch-tiled Pallas kernel.

    x: (B, dims[0]) f32;  w_padded: pre-padded bf16 (dims_p[i], dims_p[i+1]).
    """
    n = len(w_padded)
    B = x.shape[0]
    Bp = _round_up(max(B, tm), tm)

    x_p = _pad2d(x.astype(jnp.float32), Bp, dims_p[0])
    grid = (Bp // tm,)

    in_specs = [pl.BlockSpec((tm, dims_p[0]), lambda i: (i, 0))]
    for j in range(n):
        # Constant index_map -> weight stays VMEM-resident across batch tiles.
        in_specs.append(pl.BlockSpec((dims_p[j], dims_p[j + 1]), lambda i: (0, 0)))
    out_specs = pl.BlockSpec((tm, dims_p[-1]), lambda i: (i, 0))

    flops = 2 * Bp * sum(dims_p[i] * dims_p[i + 1] for i in range(n))
    transcendentals = 2 * Bp * sum(dims_p[1:])
    bytes_accessed = (x_p.size * 4
                      + sum(w.size * 2 for w in w_padded)
                      + Bp * dims_p[-1] * 4)

    out_p = pl.pallas_call(
        _make_fused_kernel(n),
        out_shape=jax.ShapeDtypeStruct((Bp, dims_p[-1]), jnp.float32),
        grid=grid,
        in_specs=in_specs,
        out_specs=out_specs,
        compiler_params=pltpu.CompilerParams(
            dimension_semantics=("parallel",),          # v7x: shard batch tiles over TCs
            vmem_limit_bytes=_vmem_limit_bytes(dims_p, tm),
        ),
        cost_estimate=pl.CostEstimate(
            flops=flops,
            transcendentals=transcendentals,
            bytes_accessed=bytes_accessed,
        ),
    )(x_p, *w_padded)

    return out_p[:B, :dims[-1]]


def init_weights(key, size_tab):
    """Uniform(-1, 1) init, matching torch.nn.init.uniform_(w, a=-1, b=1).
    Stored as (in, out) = transpose of PyTorch's (out, in)."""
    weights = []
    for i in range(len(size_tab) - 1):
        key, sub = jax.random.split(key)
        w = jax.random.uniform(
            sub, (size_tab[i], size_tab[i + 1]), dtype=jnp.float32,
            minval=-1.0, maxval=1.0)
        weights.append(w)
    return weights


def reference_forward(x, weights, k_tab):
    a = x
    for w, k in zip(weights, k_tab):
        a = _rho(k * (a @ w))
    return a


if __name__ == "__main__":
    # Small shapes consistent with the module: size_tab defines the layer widths.
    size_tab = [32, 64, 16]
    k_tab = [1.0, 0.5]
    batch = 8

    key = jax.random.PRNGKey(0)
    key, xkey = jax.random.split(key)
    x = jax.random.normal(xkey, (batch, size_tab[0]), dtype=jnp.float32)
    weights = init_weights(key, size_tab)

    # Weight prep (k-fold, pad, bf16 cast) done ONCE, off the per-call path.
    w_padded, dims, dims_p = prepare_params(weights, k_tab)
    w_padded = jax.block_until_ready(w_padded)

    fwd = functools.partial(teacher_net_forward, w_padded=w_padded,
                            dims=dims, dims_p=dims_p)
    out = jax.block_until_ready(fwd(x))

    ref = reference_forward(x, weights, k_tab)
    assert out.shape == (batch, size_tab[-1]), out.shape
    # bf16 MXU operands (f32 accumulation + f32 rho) -> small drift vs f32 reference.
    max_err = float(jnp.max(jnp.abs(out - ref)))
    assert jnp.allclose(out, ref, atol=1e-2, rtol=5e-2), max_err

    print("KERNEL_OK")
</pallas_src>

<mosaic_0001>
module attributes {stable_mosaic.version = 11 : i64} {
  func.func @kernel(%arg0: i32, %arg1: memref<128x128xf32, #tpu.memory_space<vmem>>, %arg2: memref<128x128xbf16, #tpu.memory_space<vmem>>, %arg3: memref<128x128xbf16, #tpu.memory_space<vmem>>, %arg4: memref<128x128xf32, #tpu.memory_space<vmem>>) attributes {dimension_semantics = [#tpu.dimension_semantics<parallel>], iteration_bounds = array<i64: 1>, scalar_prefetch = 0 : i64, scratch_operands = 0 : i64, tpu.core_type = #tpu.core_type<tc>, window_params = [{transform_indices = @transform_0, window_bounds = array<i64: 128, 128>}, {pipeline_mode = #tpu.pipeline_mode<synchronous>, transform_indices = @transform_1, window_bounds = array<i64: 128, 128>}, {pipeline_mode = #tpu.pipeline_mode<synchronous>, transform_indices = @transform_2, window_bounds = array<i64: 128, 128>}, {transform_indices = @transform_3, window_bounds = array<i64: 128, 128>}]} {
    %c0 = arith.constant 0 : index
    %c0_0 = arith.constant 0 : index
    %0 = vector.load %arg1[%c0, %c0_0] : memref<128x128xf32, #tpu.memory_space<vmem>>, vector<128x128xf32>
    %1 = arith.truncf %0 : vector<128x128xf32> to vector<128x128xbf16>
    %c0_1 = arith.constant 0 : index
    %c0_2 = arith.constant 0 : index
    %2 = vector.load %arg2[%c0_1, %c0_2] : memref<128x128xbf16, #tpu.memory_space<vmem>>, vector<128x128xbf16>
    %cst = arith.constant dense<0.000000e+00> : vector<128x128xf32>
    %3 = tpu.matmul %1, %2, %cst {dimension_numbers = #tpu.dot_dimension_numbers<[1], [0], [0], [1], [0, 0, 1, 1], [], []>} : vector<128x128xbf16>, vector<128x128xbf16>, vector<128x128xf32> -> vector<128x128xf32>
    %cst_3 = arith.constant 3.000000e+00 : f32
    %4 = vector.broadcast %cst_3 : f32 to vector<128x128xf32>
    %5 = arith.subf %3, %4 : vector<128x128xf32>
    %cst_4 = arith.constant 1.000000e+00 : f32
    %6 = vector.broadcast %cst_4 : f32 to vector<128x128xf32>
    %7 = arith.mulf %6, %5 : vector<128x128xf32>
    %cst_5 = arith.constant 0.000000e+00 : f32
    %8 = vector.broadcast %cst_5 : f32 to vector<128x128xf32>
    %9 = arith.maximumf %7, %8 : vector<128x128xf32>
    %10 = math.absf %7 : vector<128x128xf32>
    %cst_6 = arith.constant 0.000000e+00 : f32
    %11 = vector.broadcast %cst_6 : f32 to vector<128x128xf32>
    %12 = arith.subf %11, %10 : vector<128x128xf32>
    %13 = math.exp %12 : vector<128x128xf32>
    %14 = math.log1p %13 : vector<128x128xf32>
    %15 = arith.addf %9, %14 : vector<128x128xf32>
    %cst_7 = arith.constant 1.000000e-01 : f32
    %16 = vector.broadcast %cst_7 : f32 to vector<128x128xf32>
    %17 = arith.mulf %16, %15 : vector<128x128xf32>
    %18 = arith.truncf %17 : vector<128x128xf32> to vector<128x128xbf16>
    %c0_8 = arith.constant 0 : index
    %c0_9 = arith.constant 0 : index
    %19 = vector.load %arg3[%c0_8, %c0_9] : memref<128x128xbf16, #tpu.memory_space<vmem>>, vector<128x128xbf16>
    %cst_10 = arith.constant dense<0.000000e+00> : vector<128x128xf32>
    %20 = tpu.matmul %18, %19, %cst_10 {dimension_numbers = #tpu.dot_dimension_numbers<[1], [0], [0], [1], [0, 0, 1, 1], [], []>} : vector<128x128xbf16>, vector<128x128xbf16>, vector<128x128xf32> -> vector<128x128xf32>
    %cst_11 = arith.constant 3.000000e+00 : f32
    %21 = vector.broadcast %cst_11 : f32 to vector<128x128xf32>
    %22 = arith.subf %20, %21 : vector<128x128xf32>
    %cst_12 = arith.constant 1.000000e+00 : f32
    %23 = vector.broadcast %cst_12 : f32 to vector<128x128xf32>
    %24 = arith.mulf %23, %22 : vector<128x128xf32>
    %cst_13 = arith.constant 0.000000e+00 : f32
    %25 = vector.broadcast %cst_13 : f32 to vector<128x128xf32>
    %26 = arith.maximumf %24, %25 : vector<128x128xf32>
    %27 = math.absf %24 : vector<128x128xf32>
    %cst_14 = arith.constant 0.000000e+00 : f32
    %28 = vector.broadcast %cst_14 : f32 to vector<128x128xf32>
    %29 = arith.subf %28, %27 : vector<128x128xf32>
    %30 = math.exp %29 : vector<128x128xf32>
    %31 = math.log1p %30 : vector<128x128xf32>
    %32 = arith.addf %26, %31 : vector<128x128xf32>
    %cst_15 = arith.constant 1.000000e-01 : f32
    %33 = vector.broadcast %cst_15 : f32 to vector<128x128xf32>
    %34 = arith.mulf %33, %32 : vector<128x128xf32>
    %c0_16 = arith.constant 0 : index
    %c0_17 = arith.constant 0 : index
    %35 = vector.load %arg4[%c0_16, %c0_17] : memref<128x128xf32, #tpu.memory_space<vmem>>, vector<128x128xf32>
    tpu.vector_store %arg4[%c0_16, %c0_17], %34 {strides = array<i32>} : memref<128x128xf32, #tpu.memory_space<vmem>>, vector<128x128xf32>,
    return
  }
  func.func @transform_0(%arg0: i32) -> (i32, i32) {
    %c0_i32 = arith.constant 0 : i32
    %c0_i32_0 = arith.constant 0 : i32
    return %arg0, %c0_i32 : i32, i32
  }
  func.func @transform_1(%arg0: i32) -> (i32, i32) {
    %c0_i32 = arith.constant 0 : i32
    %c0_i32_0 = arith.constant 0 : i32
    %c0_i32_1 = arith.constant 0 : i32
    return %c0_i32, %c0_i32_0 : i32, i32
  }
  func.func @transform_2(%arg0: i32) -> (i32, i32) {
    %c0_i32 = arith.constant 0 : i32
    %c0_i32_0 = arith.constant 0 : i32
    %c0_i32_1 = arith.constant 0 : i32
    return %c0_i32, %c0_i32_0 : i32, i32
  }
  func.func @transform_3(%arg0: i32) -> (i32, i32) {
    %c0_i32 = arith.constant 0 : i32
    %c0_i32_0 = arith.constant 0 : i32
    return %arg0, %c0_i32 : i32, i32
  }
}

</mosaic_0001>

<bundles_post_ra>
// kernel: tpu_custom_call.1
= control target key start
LH: loop header
LB: loop body
LE: loop exit
PB: predicated region body
PF: predicated region fallthrough
CT: control target
= control target key end

     0   :  { %8 = vsyncpa [#allocation3], 0  ;;  %s1835_s0 = inlined_call_operand.hbm [shape: f32[128,128], index: 0, kind: input, shape index: {}]   ;;  %s1836_s1 = inlined_call_operand.hbm [shape: bf16[128,128], index: 1, kind: input, shape index: {}]   ;;  %s1837_s2 = inlined_call_operand.hbm [shape: bf16[128,128], index: 2, kind: input, shape index: {}]   ;;  %s1838_s3 = inlined_call_operand.hbm [shape: f32[128,128], index: 3, kind: output, shape index: {}]  }
   0x1   :  { %9 = vsyncpa [#allocation6], 0 }
   0x2   :  { %10 = vsyncpa [#allocation4], 0  ;;  %s1371_s12 = smov [#allocation5]  }
   0x3   :  { %s28_s13 = sshll.u32 %s1371_s12, 4  ;;  %s29_s13 = int_to_ptr.vmem [resolvable:$true] %s28_s13 }
   0x4   :  { %s1293_s14 = scalar_lea.vmem %s29_s13, 1024  ;;  %p1298_p1 = scmp.lt.s32.totalorder %s29_s13, %s29_s13 }
   0x5   :  { %p1294_p0 = scmp.ne.s32.totalorder %s29_s13, %s1293_s14  ;;  %p1299_p2 = scmp.lt.s32.totalorder %s1293_s14, %s1293_s14 }
   0x7   :  { %p1300_p3 = por %p1299_p2, %p1298_p1 }
   0x9   :  { %p1301_p4 = pnand %p1300_p3, %p1294_p0 }
   0xb   :  { %1304 = shalt.err (!%p1301_p4)
}
   0xc   :  { %s1372_s15 = smov 64   ;;  %s1373_s16 = smov 4  }
   0xd   :  { %34 = dma.hbm_to_vmem [thread:$0]  %s1836_s1, 1024, %s29_s13, [#allocation6], %s1372_s15, %s1372_s15, %s1373_s16  }
   0xe   :  { %s1374_s19 = smov [#allocation2]  }
   0xf   :  { %s16_s20 = sshll.u32 %s1374_s19, 4  ;;  %s17_s20 = int_to_ptr.vmem [resolvable:$true] %s16_s20 }
  0x10   :  { %s1313_s21 = scalar_lea.vmem %s17_s20, 2048  ;;  %p1318_p6 = scmp.lt.s32.totalorder %s17_s20, %s17_s20 }
  0x11   :  { %p1314_p5 = scmp.ne.s32.totalorder %s17_s20, %s1313_s21  ;;  %p1319_p7 = scmp.lt.s32.totalorder %s1313_s21, %s1313_s21 }
  0x13   :  { %p1320_p8 = por %p1319_p7, %p1318_p6 }
  0x15   :  { %p1321_p9 = pnand %p1320_p8, %p1314_p5 }
  0x17   :  { %1324 = shalt.err (!%p1321_p9)
}
  0x18   :  { %s1375_s22 = smov 128   ;;  %s1376_s23 = smov 8  }
  0x19   :  { %22 = dma.hbm_to_vmem [thread:$0]  %s1835_s0, 2048, %s17_s20, [#allocation3], %s1375_s22, %s1375_s22, %s1376_s23  }
  0x1a   :  { %s1377_s1 = smov [#allocation7]  }
  0x1b   :  { %s40_s26 = sshll.u32 %s1377_s1, 4  ;;  %s41_s26 = int_to_ptr.vmem [resolvable:$true] %s40_s26 }
  0x1c   :  { %s1333_s27 = scalar_lea.vmem %s41_s26, 1024  ;;  %p1338_p11 = scmp.lt.s32.totalorder %s41_s26, %s41_s26 }
  0x1d   :  { %p1334_p10 = scmp.ne.s32.totalorder %s41_s26, %s1333_s27  ;;  %p1339_p12 = scmp.lt.s32.totalorder %s1333_s27, %s1333_s27 }
  0x1f   :  { %p1340_p13 = por %p1339_p12, %p1338_p11 }
  0x21   :  { %p1341_p0 = pnand %p1340_p13, %p1334_p10 }
  0x23   :  { %1344 = shalt.err (!%p1341_p0)
}
  0x24   :  { %46 = dma.hbm_to_vmem [thread:$0]  %s1837_s2, 1024, %s41_s26, [#allocation6], %s1372_s15, %s1372_s15, %s1373_s16  }
  0x25   :  { %1365 = dma.done.wait [#allocation3], 2048  }
  0x26   :  { %1366 = vsyncadd [#allocation3], 4294965248 }
  0x27   :  { %1367 = dma.done.wait [#allocation6], 2048  }
  0x28   :  { %1368 = vsyncadd [#allocation6], 4294965248  ;;  %v1141_v0 = vld [vmem:[#allocation5 + $0x38] sm:$0xff]   ;;  %v1142_v1 = vld [vmem:[#allocation5 + $0x30] sm:$0xff]   ;;  %s1378_s0 = smov [#allocation8]  }
  0x29   :  { %1069 = vmatprep.subr.bf16.mxu0 %v1141_v0  ;;  %v1143_v2 = vld [vmem:[#allocation5 + $0x28] sm:$0xff]   ;;  %v1144_v3 = vld [vmem:[#allocation5 + $0x20] sm:$0xff]   ;;  %v1145_v7 = vld [vmem:[#allocation5 + $0x18] sm:$0xff]   ;;  %s976_s2 = sshll.u32 %s1378_s0, 4  ;;  %s977_s2 = int_to_ptr.vmem [resolvable:$true] %s976_s2 }
  0x2a   :  { %1070 = vmatpush3.bf16.msra.mxu0 %v1141_v0  ;;  %v57_v4 = vld [vmem:[#allocation2] sm:$0xff]  ;;  %v58_v5 = vld [vmem:[#allocation2 + $0x8] sm:$0xff]  ;;  %v1146_v8 = vld [vmem:[#allocation5 + $0x10] sm:$0xff]   ;;  %s1345_s30 = scalar_lea.vmem %s977_s2, 2048  ;;  %p1350_p2 = scmp.lt.s32.totalorder %s977_s2, %s977_s2 }
  0x2b   :  { %1071 = vmatprep.subr.bf16.mxu0 %v1142_v1  ;;  %v73_v6 = vpack.c.bf16 %v58_v5, %v57_v4  ;;  %v1147_v9 = vld [vmem:[#allocation5 + $0x8] sm:$0xff]   ;;  %v1148_v10 = vld [vmem:[#allocation5] sm:$0xff]   ;;  %v59_v11 = vld [vmem:[#allocation2 + $0x10] sm:$0xff]  ;;  %p1346_p1 = scmp.ne.s32.totalorder %s977_s2, %s1345_s30  ;;  %p1351_p3 = scmp.lt.s32.totalorder %s1345_s30, %s1345_s30 }
  0x2c   :  { %v60_v12 = vld [vmem:[#allocation2 + $0x18] sm:$0xff]  ;;  %v61_v13 = vld [vmem:[#allocation2 + $0x20] sm:$0xff]  ;;  %v62_v14 = vld [vmem:[#allocation2 + $0x28] sm:$0xff] }
  0x2d   :  { %1085 = vmatprep.mubr.bf16.mxu0 %v73_v6  ;;  %v74_v15 = vpack.c.bf16 %v60_v12, %v59_v11  ;;  %v75_v16 = vpack.c.bf16 %v62_v14, %v61_v13  ;;  %v63_v17 = vld [vmem:[#allocation2 + $0x30] sm:$0xff]  ;;  %v64_v18 = vld [vmem:[#allocation2 + $0x38] sm:$0xff]  ;;  %v65_v19 = vld [vmem:[#allocation2 + $0x40] sm:$0xff]  ;;  %p1352_p4 = por %p1351_p3, %p1350_p2 }
  0x2e   :  { %1072 = vmatpush3.bf16.msra.mxu0 %v1142_v1  ;;  %v66_v20 = vld [vmem:[#allocation2 + $0x48] sm:$0xff]  ;;  %v76_v21 = vpack.c.bf16 %v64_v18, %v63_v17  ;;  %v67_v23 = vld [vmem:[#allocation2 + $0x50] sm:$0xff]  ;;  %v68_v24 = vld [vmem:[#allocation2 + $0x58] sm:$0xff] }
  0x2f   :  { %1073 = vmatprep.subr.bf16.mxu0 %v1143_v2  ;;  %v77_v22 = vpack.c.bf16 %v66_v20, %v65_v19  ;;  %v69_v25 = vld [vmem:[#allocation2 + $0x60] sm:$0xff]  ;;  %v70_v26 = vld [vmem:[#allocation2 + $0x68] sm:$0xff]  ;;  %v78_v27 = vpack.c.bf16 %v68_v24, %v67_v23  ;;  %v71_v29 = vld [vmem:[#allocation2 + $0x70] sm:$0xff]  ;;  %p1353_p5 = pnand %p1352_p4, %p1346_p1 }
  0x30   :  { %v79_v28 = vpack.c.bf16 %v70_v26, %v69_v25  ;;  %v72_v30 = vld [vmem:[#allocation2 + $0x78] sm:$0xff]  ;;  %v1150_v33 = vld [vmem:[#allocation7 + $0x30] sm:$0xff]   ;;  %v1151_v34 = vld [vmem:[#allocation7 + $0x28] sm:$0xff]  }
  0x31   :  { %v80_v31 = vpack.c.bf16 %v72_v30, %v71_v29  ;;  %v1149_v32 = vld [vmem:[#allocation7 + $0x38] sm:$0xff]   ;;  %v1152_v35 = vld [vmem:[#allocation7 + $0x20] sm:$0xff]   ;;  %v1154_v37 = vld [vmem:[#allocation7 + $0x10] sm:$0xff]  }
  0x32   :  { %1074 = vmatpush3.bf16.msra.mxu0 %v1143_v2  ;;  %1101 = vmatprep.subr.bf16.mxu1 %v1149_v32  ;;  %v1153_v36 = vld [vmem:[#allocation7 + $0x18] sm:$0xff]   ;;  %v1155_v38 = vld [vmem:[#allocation7 + $0x8] sm:$0xff]   ;;  %v1156_v39 = vld [vmem:[#allocation7] sm:$0xff]  }
  0x33   :  { %1075 = vmatprep.subr.bf16.mxu0 %v1144_v3  ;;  %1102 = vmatpush3.bf16.msra.mxu1 %v1149_v32 }
  0x34   :  { %1103 = vmatprep.subr.bf16.mxu1 %v1150_v33 }
  0x36   :  { %1076 = vmatpush3.bf16.msra.mxu0 %v1144_v3 }
  0x37   :  { %1077 = vmatprep.subr.bf16.mxu0 %v1145_v7  ;;  %1104 = vmatpush3.bf16.msra.mxu1 %v1150_v33 }
  0x38   :  { %1105 = vmatprep.subr.bf16.mxu1 %v1151_v34 }
  0x3a   :  { %1078 = vmatpush3.bf16.msra.mxu0 %v1145_v7 }
  0x3b   :  { %1079 = vmatprep.subr.bf16.mxu0 %v1146_v8  ;;  %1106 = vmatpush3.bf16.msra.mxu1 %v1151_v34 }
  0x3c   :  { %1107 = vmatprep.subr.bf16.mxu1 %v1152_v35 }
  0x3e   :  { %1080 = vmatpush3.bf16.msra.mxu0 %v1146_v8 }
  0x3f   :  { %1081 = vmatprep.subr.bf16.mxu0 %v1147_v9  ;;  %1108 = vmatpush3.bf16.msra.mxu1 %v1152_v35 }
  0x40   :  { %1109 = vmatprep.subr.bf16.mxu1 %v1153_v36 }
  0x42   :  { %1082 = vmatpush3.bf16.msra.mxu0 %v1147_v9 }
  0x43   :  { %1083 = vmatprep.subr.bf16.mxu0 %v1148_v10  ;;  %1110 = vmatpush3.bf16.msra.mxu1 %v1153_v36 }
  0x44   :  { %1111 = vmatprep.subr.bf16.mxu1 %v1154_v37 }
  0x46   :  { %1084 = vmatpush3.bf16.msra.mxu0 %v1148_v10 }
  0x47   :  { %1112 = vmatpush3.bf16.msra.mxu1 %v1154_v37 }
  0x48   :  { %1113 = vmatprep.subr.bf16.mxu1 %v1155_v38 }
  0x49   :  { %1086 = vmatmul.mubr.bf16.vlgmr.msra.gmra.mxu0 %v74_v15 }
  0x4a   :  { %1089 = vmatprep.mubr.bf16.mxu0 %v75_v16 }
  0x4b   :  { %1114 = vmatpush3.bf16.msra.mxu1 %v1155_v38 }
  0x4c   :  { %1115 = vmatprep.subr.bf16.mxu1 %v1156_v39 }
  0x4f   :  { %1116 = vmatpush3.bf16.msra.mxu1 %v1156_v39 }
  0x51   :  { %1090 = vmatmul.mubr.bf16.gmra.mxu0 %v76_v21 }
  0x52   :  { %1093 = vmatprep.mubr.bf16.mxu0 %v77_v22 }
  0x59   :  { %1094 = vmatmul.mubr.bf16.gmra.mxu0 %v78_v27 }
  0x5a   :  { %1097 = vmatprep.mubr.bf16.mxu0 %v79_v28 }
  0x61   :  { %1098 = vmatmul.mubr.bf16.gmra.mxu0 %v80_v31 }
 0x109   :  { %v1087_v40 = vpop.f32.mrf.mxu0 }
 0x10a   :  { %v1411_v46 = vadd.f32 -3.0, %v1087_v40 }
 0x10b   :  { %v179_v41 = vpop.f32.mrf.mxu0 }
 0x10c   :  { %v276_v49 = vand.u32 2147483647, %v1411_v46  ;;  %v1427_v1 = vadd.f32 -3.0, %v179_v41 }
 0x10d   :  { %v1088_v42 = vpop.f32.mrf.mxu0 }
 0x10e   :  { %v1414_v50 = vadd.f32 -3.0, %v1088_v42  ;;  %v292_v53 = vsub.f32 0.0, %v276_v49  ;;  %v274_v9 = vand.u32 2147483647, %v1427_v1 }
 0x10f   :  { %v182_v43 = vpop.f32.mrf.mxu0 }
 0x110   :  { %v277_v54 = vand.u32 2147483647, %v1414_v50  ;;  %v310_v59 = vmul.f32 1.442695, %v292_v53  ;;  %v1436_v10 = vadd.f32 -3.0, %v182_v43  ;;  %v290_v18 = vsub.f32 0.0, %v274_v9 }
 0x111   :  { %v1091_v44 = vpop.f32.mrf.mxu0 }
 0x112   :  { %v1419_v56 = vadd.f32 -3.0, %v1091_v44  ;;  %v293_v60 = vsub.f32 0.0, %v277_v54  ;;  %1157 = vpow2.f32 %v310_v59  ;;  %v275_v19 = vand.u32 2147483647, %v1436_v10 }
 0x113   :  { %v195_v45 = vpop.f32.mrf.mxu0  ;;  %v306_v27 = vmul.f32 1.442695, %v290_v18  ;;  %v260_v59 = vmax.f32 %v1411_v46, 0.0 }
 0x114   :  { %v1421_v58 = vadd.f32 -3.0, %v195_v45  ;;  %v280_v62 = vand.u32 2147483647, %v1419_v56  ;;  %v312_v4 = vmul.f32 1.442695, %v293_v60  ;;  %v291_v28 = vsub.f32 0.0, %v275_v19 }
 0x115   :  { %v1092_v47 = vpop.f32.mrf.mxu0 }
 0x116   :  { %v1425_v63 = vadd.f32 -3.0, %v1092_v47  ;;  %v278_v2 = vand.u32 2147483647, %v1421_v58  ;;  %v296_v7 = vsub.f32 0.0, %v280_v62  ;;  %1159 = vpow2.f32 %v312_v4 }
 0x117   :  { %v198_v48 = vpop.f32.mrf.mxu0  ;;  %v308_v35 = vmul.f32 1.442695, %v291_v28  ;;  %v259_v4 = vmax.f32 %v1436_v10, 0.0 }
 0x118   :  { %v1417_v55 = vadd.f32 -3.0, %v198_v48  ;;  %v281_v8 = vand.u32 2147483647, %v1425_v63  ;;  %v294_v11 = vsub.f32 0.0, %v278_v2  ;;  %v318_v16 = vmul.f32 1.442695, %v296_v7 }
 0x119   :  { %v1095_v51 = vpop.f32.mrf.mxu0  ;;  %v261_v2 = vmax.f32 %v1414_v50, 0.0 }
 0x11a   :  { %v279_v61 = vand.u32 2147483647, %v1417_v55  ;;  %v297_v17 = vsub.f32 0.0, %v281_v8  ;;  %v314_v20 = vmul.f32 1.442695, %v294_v11  ;;  %v1441_v21 = vadd.f32 -3.0, %v1095_v51 }
 0x11b   :  { %v211_v52 = vpop.f32.mrf.mxu0  ;;  %v263_v19 = vmax.f32 %v1417_v55, 0.0 }
 0x11c   :  { %v1430_v3 = vadd.f32 -3.0, %v211_v52  ;;  %v295_v5 = vsub.f32 0.0, %v279_v61  ;;  %v320_v25 = vmul.f32 1.442695, %v297_v17  ;;  %v284_v30 = vand.u32 2147483647, %v1441_v21 }
 0x11d   :  { %v1096_v57 = vpop.f32.mrf.mxu0  ;;  %v258_v61 = vmax.f32 %v1427_v1, 0.0 }
 0x11e   :  { %v282_v12 = vand.u32 2147483647, %v1430_v3  ;;  %v316_v14 = vmul.f32 1.442695, %v295_v5  ;;  %v1443_v26 = vadd.f32 -3.0, %v1096_v57  ;;  %v300_v37 = vsub.f32 0.0, %v284_v30 }
 0x11f   :  { %v214_v0 = vpop.f32.mrf.mxu0  ;;  %v1448_v33 = vpop.eup %1157 }
 0x120   :  { %v1432_v6 = vadd.f32 -3.0, %v214_v0  ;;  %v298_v22 = vsub.f32 0.0, %v282_v12  ;;  %1161 = vpow2.f32 %v316_v14  ;;  %v285_v34 = vand.u32 2147483647, %v1443_v26 }
 0x121   :  { %v1099_v13 = vpop.f32.mrf.mxu0  ;;  %1163 = vpow2.f32 %v318_v16  ;;  %v356_v39 = vadd.f32 1.0, %v1448_v33  ;;  %v326_v45 = vmul.f32 1.442695, %v300_v37  ;;  %v262_v14 = vmax.f32 %v1421_v58, 0.0 }
 0x122   :  { %v283_v15 = vand.u32 2147483647, %v1432_v6  ;;  %1165 = vpow2.f32 %v314_v20  ;;  %v322_v31 = vmul.f32 1.442695, %v298_v22  ;;  %v301_v41 = vsub.f32 0.0, %v285_v34 }
 0x123   :  { %v227_v23 = vpop.f32.mrf.mxu0  ;;  %1167 = vpow2.f32 %v320_v25  ;;  %v1453_v40 = vpop.eup %1159  ;;  %v1455_v42 = vadd.f32 -3.0, %v1099_v13  ;;  %v359_v18 = vmul.f32 -0.5, %v1448_v33 }
 0x124   :  { %v299_v24 = vsub.f32 0.0, %v283_v15  ;;  %v1445_v29 = vadd.f32 -3.0, %v227_v23  ;;  %1169 = vpow2.f32 %v306_v27  ;;  %v365_v47 = vadd.f32 1.0, %v1453_v40 }
 0x125   :  { %1171 = vpow2.f32 %v322_v31  ;;  %v1100_v38 = vpop.f32.mrf.mxu0  ;;  %v328_v49 = vmul.f32 1.442695, %v301_v41  ;;  %v288_v52 = vand.u32 2147483647, %v1455_v42  ;;  %v362_v23 = vand.u32 2147483647, %v1448_v33 }
 0x126   :  { %v324_v32 = vmul.f32 1.442695, %v299_v24  ;;  %v286_v36 = vand.u32 2147483647, %v1445_v29  ;;  %v1457_v44 = vadd.f32 -3.0, %v1100_v38 }
 0x127   :  { %v230_v60 = vpop.f32.mrf.mxu0  ;;  %v304_v9 = vsub.f32 0.0, %v288_v52  ;;  %vm1502_vm0 = vcmp.lt.f32.partialorder %v362_v23, 0.0004427343 }
 0x128   :  { %1173 = vpow2.f32 %v324_v32  ;;  %v302_v43 = vsub.f32 0.0, %v286_v36  ;;  %v289_v54 = vand.u32 2147483647, %v1457_v44  ;;  %v1477_v11 = vadd.f32 -3.0, %v230_v60 }
 0x129   :  { %1175 = vpow2.f32 %v308_v35  ;;  %v334_v27 = vmul.f32 1.442695, %v304_v9  ;;  %v368_v32 = vmul.f32 -0.5, %v1453_v40  ;;  %v360_v36 = vadd.f32 1.0, %v359_v18 }
 0x12a   :  { %1177 = vlog2.f32 %v356_v39  ;;  %v330_v53 = vmul.f32 1.442695, %v302_v43  ;;  %v305_v0 = vsub.f32 0.0, %v289_v54  ;;  %v287_v28 = vand.u32 2147483647, %v1477_v11 }
 0x12b   :  { %1179 = vpow2.f32 %v326_v45 }
 0x12c   :  { %1181 = vlog2.f32 %v365_v47  ;;  %v336_v16 = vmul.f32 1.442695, %v305_v0  ;;  %v303_v38 = vsub.f32 0.0, %v287_v28  ;;  %v371_v47 = vand.u32 2147483647, %v1453_v40 }
 0x12d   :  { %v1460_v48 = vpop.eup %1161  ;;  %1183 = vpow2.f32 %v328_v49 }
 0x12e   :  { %v1462_v51 = vpop.eup %1163  ;;  %v383_v62 = vadd.f32 1.0, %v1460_v48  ;;  %1185 = vpow2.f32 %v330_v53  ;;  %v369_v53 = vadd.f32 1.0, %v368_v32  ;;  %v332_v60 = vmul.f32 1.442695, %v303_v38 }
 0x12f   :  { %v1466_v57 = vpop.eup %1165  ;;  %v392_v5 = vadd.f32 1.0, %v1462_v51  ;;  %v395_v34 = vmul.f32 -0.5, %v1462_v51  ;;  %v386_v23 = vmul.f32 -0.5, %v1460_v48  ;;  %vm1519_vm1 = vcmp.lt.f32.partialorder %v371_v47, 0.0004427343 }
 0x130   :  { %v1474_v7 = vpop.eup %1167  ;;  %v374_v8 = vadd.f32 1.0, %v1466_v57  ;;  %1187 = vlog2.f32 %v383_v62  ;;  %v377_v43 = vmul.f32 -0.5, %v1466_v57  ;;  %v380_v18 = vand.u32 2147483647, %v1466_v57 }
 0x131   :  { %v1479_v12 = vpop.eup %1169  ;;  %1189 = vlog2.f32 %v392_v5  ;;  %v401_v24 = vadd.f32 1.0, %v1474_v7  ;;  %v404_v49 = vmul.f32 -0.5, %v1474_v7  ;;  %v396_v54 = vadd.f32 1.0, %v395_v34 }
 0x132   :  { %v1484_v17 = vpop.eup %1171  ;;  %1191 = vlog2.f32 %v374_v8  ;;  %v338_v30 = vadd.f32 1.0, %v1479_v12  ;;  %v361_v5 = vmul.f32 %v1448_v33, %v360_v36  ;;  %v267_v8 = vmax.f32 %v1432_v6, 0.0 }
 0x133   :  { %v410_v35 = vadd.f32 1.0, %v1484_v17  ;;  %1193 = vpow2.f32 %v336_v16  ;;  %v378_v16 = vadd.f32 1.0, %v377_v43  ;;  %v405_v28 = vadd.f32 1.0, %v404_v49 }
 0x134   :  { %1195 = vlog2.f32 %v338_v30  ;;  %v389_v30 = vand.u32 2147483647, %v1460_v48  ;;  %v370_v32 = vmul.f32 %v1453_v40, %v369_v53  ;;  %v1528_v34 = vmul.f32 %v1462_v51, %v396_v54 }
 0x135   :  { %v1489_v22 = vpop.eup %1173  ;;  %1197 = vlog2.f32 %v401_v24  ;;  %v407_v38 = vand.u32 2147483647, %v1474_v7  ;;  %v341_v43 = vmul.f32 -0.5, %v1479_v12  ;;  %v379_v49 = vmul.f32 %v1466_v57, %v378_v16 }
 0x136   :  { %v1496_v31 = vpop.eup %1175  ;;  %v419_v37 = vadd.f32 1.0, %v1489_v22  ;;  %1199 = vpow2.f32 %v334_v27  ;;  %vm1538_vm2 = vcmp.lt.f32.partialorder %v380_v18, 0.0004427343  ;;  %v1544_v41 = vmul.f32 %v1474_v7, %v405_v28 }
 0x137   :  { %v1178_v39 = vpop.eup %1177  ;;  %v347_v52 = vadd.f32 1.0, %v1496_v31  ;;  %1201 = vlog2.f32 %v410_v35  ;;  %v398_v35 = vand.u32 2147483647, %v1462_v51  ;;  %vm1546_vm3 = vcmp.lt.f32.partialorder %v389_v30, 0.0004427343 }
 0x138   :  { %v1511_v62 = vpop.eup %1179  ;;  %v358_v0 = vmul.f32 0.6931472, %v1178_v39  ;;  %1203 = vlog2.f32 %v419_v37  ;;  %v342_v28 = vadd.f32 1.0, %v341_v43  ;;  %v350_v30 = vmul.f32 -0.5, %v1496_v31 }
 0x139   :  { %v1182_v9 = vpop.eup %1181  ;;  %1205 = vpow2.f32 %v332_v60  ;;  %v428_v39 = vadd.f32 1.0, %v1511_v62  ;;  %v431_v16 = vmul.f32 -0.5, %v1511_v62  ;;  %v416_v46 = vand.u32 2147483647, %v1484_v17 }
 0x13a   :  { %v1517_v24 = vpop.eup %1183  ;;  %1207 = vlog2.f32 %v347_v52  ;;  %v364_v37 = vsel %vm1502_vm0, %v361_v5, %v358_v0  ;;  %v387_v52 = vadd.f32 1.0, %v386_v23  ;;  %v367_v54 = vmul.f32 0.6931472, %v1182_v9 }
 0x13b   :  { %v1524_v33 = vpop.eup %1185  ;;  %v437_v51 = vadd.f32 1.0, %v1517_v24  ;;  %v1553_v57 = vadd.f32 %v364_v37, %v260_v59  ;;  %v413_v9 = vmul.f32 -0.5, %v1484_v17  ;;  %1209 = vlog2.f32 %v428_v39 }
 0x13c   :  { %v446_v0 = vadd.f32 1.0, %v1524_v33  ;;  %v388_v36 = vmul.f32 %v1460_v48, %v387_v52  ;;  %v344_v59 = vand.u32 2147483647, %v1479_v12  ;;  %v373_v45 = vsel %vm1519_vm1, %v370_v32, %v367_v54 }
 0x13d   :  { %v1188_v47 = vpop.eup %1187  ;;  %1211 = vlog2.f32 %v437_v51  ;;  %v422_v25 = vmul.f32 -0.5, %v1489_v22  ;;  %v1569_v43 = vadd.f32 1.0, %v431_v16  ;;  %v440_v48 = vmul.f32 -0.5, %v1517_v24 }
 0x13e   :  { %v1190_v53 = vpop.eup %1189  ;;  %v385_v7 = vmul.f32 0.6931472, %v1188_v47  ;;  %1213 = vlog2.f32 %v446_v0  ;;  %v414_v47 = vadd.f32 1.0, %v413_v9  ;;  %vm1572_vm4 = vcmp.lt.f32.partialorder %v407_v38, 0.0004427343 }
 0x13f   :  { %v1192_v5 = vpop.eup %1191  ;;  %v343_v54 = vmul.f32 %v1479_v12, %v342_v28  ;;  %v351_v0 = vadd.f32 1.0, %v350_v30  ;;  %v485_v16 = vadd.f32 %v373_v45, %v261_v2  ;;  %vm1582_vm5 = vcmp.lt.f32.partialorder %v398_v35, 0.0004427343 }
 0x140   :  { %v1558_v23 = vpop.eup %1193  ;;  %v376_v13 = vmul.f32 0.6931472, %v1192_v5  ;;  %v391_v27 = vsel %vm1546_vm3, %v388_v36, %v385_v7  ;;  %vm1586_vm6 = vcmp.lt.f32.partialorder %v416_v46, 0.0004427343  ;;  %vm1590_vm7 = vcmp.lt.f32.partialorder %v344_v59, 0.0004427343 }
 0x141   :  { %v1196_v20 = vpop.eup %1195  ;;  %v473_v32 = vadd.f32 1.0, %v1558_v23  ;;  %v353_v36 = vand.u32 2147483647, %v1496_v31  ;;  %v423_v2 = vadd.f32 1.0, %v422_v25  ;;  %v425_v45 = vand.u32 2147483647, %v1489_v22 }
 0x142   :  { %v1198_v37 = vpop.eup %1197  ;;  %v340_v52 = vmul.f32 0.6931472, %v1196_v20  ;;  %v382_v50 = vsel %vm1538_vm2, %v379_v49, %v376_v13  ;;  %v487_v28 = vadd.f32 %v391_v27, %v263_v19  ;;  %v352_v13 = vmul.f32 %v1496_v31, %v351_v0 }
 0x143   :  { %v1567_v39 = vpop.eup %1199  ;;  %v403_v7 = vmul.f32 0.6931472, %v1198_v37  ;;  %1215 = vlog2.f32 %v473_v32  ;;  %v486_v25 = vadd.f32 %v382_v50, %v262_v14  ;;  %vm354_vm8 = vcmp.lt.f32.partialorder %v353_v36, 0.0004427343 }
 0x144   :  { %v1202_v18 = vpop.eup %1201  ;;  %v346_v35 = vsel %vm1590_vm7, %v343_v54, %v340_v52  ;;  %v464_v30 = vadd.f32 1.0, %v1567_v39  ;;  %v394_v40 = vmul.f32 0.6931472, %v1190_v53  ;;  %v424_v19 = vmul.f32 %v1489_v22, %v423_v2 }
 0x145   :  { %v1204_v5 = vpop.eup %1203  ;;  %v482_v49 = vadd.f32 %v346_v35, %v258_v61  ;;  %v412_v55 = vmul.f32 0.6931472, %v1202_v18  ;;  %v503_v52 = vmul.f32 0.1, %v487_v28  ;;  %vm1612_vm9 = vcmp.lt.f32.partialorder %v425_v45, 0.0004427343 }
 0x146   :  { %v1595_v12 = vpop.eup %1205  ;;  %v421_v59 = vmul.f32 0.6931472, %v1204_v5  ;;  %v501_v14 = vmul.f32 0.1, %v485_v16  ;;  %v415_v31 = vmul.f32 %v1484_v17, %v414_v47  ;;  %v449_v61 = vmul.f32 -0.5, %v1524_v33 }
 0x147   :  { %v1208_v60 = vpop.eup %1207  ;;  %v455_v46 = vadd.f32 1.0, %v1595_v12  ;;  %v502_v22 = vmul.f32 0.1, %v486_v25  ;;  %v498_v18 = vmul.f32 0.1, %v482_v49  ;;  %v441_v47 = vadd.f32 1.0, %v440_v48 }
 0x148   :  { %v349_v15 = vmul.f32 0.6931472, %v1208_v60  ;;  %v427_v1 = vsel %vm1612_vm9, %v424_v19, %v421_v59  ;;  %v1210_v53 = vpop.eup %1209  ;;  %v500_v10 = vmul.f32 0.1, %v1553_v57  ;;  %v418_v17 = vsel %vm1586_vm6, %v415_v31, %v412_v55 }
 0x149   :  { %1217 = vlog2.f32 %v455_v46  ;;  %v491_v5 = vadd.f32 %v427_v1, %v267_v8  ;;  %v458_v51 = vmul.f32 -0.5, %v1595_v12  ;;  %v516_v16 = vpack.c.bf16 %v503_v52, %v502_v22 }
 0x14a   :  { %v355_v37 = vsel %vm354_vm8, %v352_v13, %v349_v15  ;;  %1219 = vlog2.f32 %v464_v30  ;;  %v409_v15 = vsel %vm1572_vm4, %v1544_v41, %v403_v7  ;;  %v1212_v54 = vpop.eup %1211  ;;  %v1857_v38 = vmax.f32 %v1425_v63, 0.0 }
 0x14b   :  { %v483_v58 = vadd.f32 %v355_v37, %v259_v4  ;;  %v400_v4 = vsel %vm1582_vm5, %v1528_v34, %v394_v40  ;;  %v1214_v0 = vpop.eup %1213  ;;  %v443_v57 = vand.u32 2147483647, %v1517_v24  ;;  %v450_v50 = vadd.f32 1.0, %v449_v61 }
 0x14c   :  { %v489_v36 = vadd.f32 %v409_v15, %v1857_v38  ;;  %v515_v9 = vpack.c.bf16 %v501_v14, %v500_v10  ;;  %v1858_v34 = vand.u32 2147483647, %v1511_v62  ;;  %v1861_v6 = vmax.f32 %v1430_v3, 0.0 }
 0x14d   :  { %v499_v32 = vmul.f32 0.1, %v483_v58  ;;  %v439_v48 = vmul.f32 0.6931472, %v1212_v54  ;;  %v452_v2 = vand.u32 2147483647, %v1524_v33  ;;  %v433_v60 = vmul.f32 %v1511_v62, %v1569_v43 }
 0x14e   :  { %vm1639_vm10 = vcmp.lt.f32.partialorder %v1858_v34, 0.0004427343  ;;  %v490_v8 = vadd.f32 %v418_v17, %v1861_v6  ;;  %v1862_v63 = vmax.f32 %v1419_v56, 0.0  ;;  %v430_v35 = vmul.f32 0.6931472, %v1210_v53 }
 0x14f   :  { %v514_v41 = vpack.c.bf16 %v499_v32, %v498_v18  ;;  %v448_v7 = vmul.f32 0.6931472, %v1214_v0  ;;  %v442_v28 = vmul.f32 %v1517_v24, %v441_v47  ;;  %v507_v30 = vmul.f32 0.1, %v491_v5 }
 0x150   :  { %v488_v45 = vadd.f32 %v400_v4, %v1862_v63  ;;  %v476_v46 = vmul.f32 -0.5, %v1558_v23  ;;  %v459_v3 = vadd.f32 1.0, %v458_v51  ;;  %v505_v59 = vmul.f32 0.1, %v489_v36  ;;  %v1216_v49 = vpop.eup %1215 }
 0x151   :  { %1117 = vmatprep.mubr.bf16.mxu1 %v514_v41  ;;  %vm1652_vm11 = vcmp.lt.f32.partialorder %v443_v57, 0.0004427343  ;;  %v451_v56 = vmul.f32 %v1524_v33, %v450_v50  ;;  %v461_v25 = vand.u32 2147483647, %v1595_v12  ;;  %v506_v62 = vmul.f32 0.1, %v490_v8 }
 0x152   :  { %1118 = vmatmul.mubr.bf16.vlgmr.msra.gmra.mxu1 %v515_v9  ;;  %v445_v43 = vsel %vm1652_vm11, %v442_v28, %v439_v48  ;;  %v467_v24 = vmul.f32 -0.5, %v1567_v39  ;;  %vm1661_vm12 = vcmp.lt.f32.partialorder %v452_v2, 0.0004427343  ;;  %v504_v19 = vmul.f32 0.1, %v488_v45 }
 0x153   :  { %1121 = vmatprep.mubr.bf16.mxu1 %v516_v16  ;;  %v436_v37 = vsel %vm1639_vm10, %v433_v60, %v430_v35  ;;  %v454_v33 = vsel %vm1661_vm12, %v451_v56, %v448_v7  ;;  %v271_v52 = vmax.f32 %v1477_v11, 0.0  ;;  %v477_v27 = vadd.f32 1.0, %v476_v46 }
 0x154   :  { %v460_v14 = vmul.f32 %v1595_v12, %v459_v3  ;;  %v518_v31 = vpack.c.bf16 %v507_v30, %v506_v62  ;;  %v1867_v61 = vmax.f32 %v1443_v26, 0.0  ;;  %v479_v22 = vand.u32 2147483647, %v1558_v23 }
 0x155   :  { %vm462_vm13 = vcmp.lt.f32.partialorder %v461_v25, 0.0004427343  ;;  %v517_v15 = vpack.c.bf16 %v505_v59, %v504_v19  ;;  %v468_v18 = vadd.f32 1.0, %v467_v24  ;;  %v1868_v32 = vmax.f32 %v1445_v29, 0.0 }
 0x156   :  { %v1218_v55 = vpop.eup %1217  ;;  %v493_v53 = vadd.f32 %v445_v43, %v1867_v61  ;;  %v475_v10 = vmul.f32 0.6931472, %v1216_v49  ;;  %v1869_v11 = vmax.f32 %v1441_v21, 0.0  ;;  %v470_v12 = vand.u32 2147483647, %v1567_v39 }
 0x157   :  { %v457_v58 = vmul.f32 0.6931472, %v1218_v55  ;;  %v1220_v1 = vpop.eup %1219  ;;  %v494_v54 = vadd.f32 %v454_v33, %v1868_v32  ;;  %v478_v26 = vmul.f32 %v1558_v23, %v477_v27  ;;  %vm480_vm14 = vcmp.lt.f32.partialorder %v479_v22, 0.0004427343 }
 0x158   :  { %v492_v17 = vadd.f32 %v436_v37, %v1869_v11  ;;  %v466_v0 = vmul.f32 0.6931472, %v1220_v1  ;;  %v509_v5 = vmul.f32 0.1, %v493_v53  ;;  %v469_v41 = vmul.f32 %v1567_v39, %v468_v18 }
 0x159   :  { %v463_v4 = vsel %vm462_vm13, %v460_v14, %v457_v58  ;;  %v510_v29 = vmul.f32 0.1, %v494_v54  ;;  %v481_v16 = vsel %vm480_vm14, %v478_v26, %v475_v10  ;;  %vm471_vm15 = vcmp.lt.f32.partialorder %v470_v12, 0.0004427343 }
 0x15a   :  { %v495_v47 = vadd.f32 %v463_v4, %v271_v52  ;;  %1122 = vmatmul.mubr.bf16.gmra.mxu1 %v517_v15  ;;  %v508_v38 = vmul.f32 0.1, %v492_v17  ;;  %v273_v21 = vmax.f32 %v1457_v44, 0.0  ;;  %v472_v36 = vsel %vm471_vm15, %v469_v41, %v466_v0 }
 0x15b   :  { %1125 = vmatprep.mubr.bf16.mxu1 %v518_v31  ;;  %v272_v50 = vmax.f32 %v1455_v42, 0.0 }
 0x15c   :  { %v511_v51 = vmul.f32 0.1, %v495_v47  ;;  %v497_v9 = vadd.f32 %v481_v16, %v273_v21  ;;  %v519_v34 = vpack.c.bf16 %v509_v5, %v508_v38 }
 0x15d   :  { %v496_v20 = vadd.f32 %v472_v36, %v272_v50 }
 0x15e   :  { %v520_v57 = vpack.c.bf16 %v511_v51, %v510_v29  ;;  %v513_v23 = vmul.f32 0.1, %v497_v9 }
 0x15f   :  { %v512_v6 = vmul.f32 0.1, %v496_v20 }
 0x161   :  { %v521_v8 = vpack.c.bf16 %v513_v23, %v512_v6 }
 0x162   :  { %1126 = vmatmul.mubr.bf16.gmra.mxu1 %v519_v34 }
 0x163   :  { %1129 = vmatprep.mubr.bf16.mxu1 %v520_v57 }
 0x16a   :  { %1130 = vmatmul.mubr.bf16.gmra.mxu1 %v521_v8 }
 0x212   :  { %v1119_v39 = vpop.f32.mrf.mxu1 }
 0x213   :  { %v1683_v48 = vadd.f32 -3.0, %v1119_v39 }
 0x214   :  { %v620_v2 = vpop.f32.mrf.mxu1 }
 0x215   :  { %v717_v63 = vand.u32 2147483647, %v1683_v48  ;;  %v1686_v44 = vadd.f32 -3.0, %v620_v2  ;;  %v701_v50 = vmax.f32 %v1683_v48, 0.0 }
 0x216   :  { %v1120_v45 = vpop.f32.mrf.mxu1 }
 0x217   :  { %v733_v35 = vsub.f32 0.0, %v717_v63  ;;  %v715_v42 = vand.u32 2147483647, %v1686_v44  ;;  %v1689_v60 = vadd.f32 -3.0, %v1120_v45  ;;  %v699_v34 = vmax.f32 %v1686_v44, 0.0 }
 0x218   :  { %v623_v7 = vpop.f32.mrf.mxu1 }
 0x219   :  { %v751_v28 = vmul.f32 1.442695, %v733_v35  ;;  %v731_v30 = vsub.f32 0.0, %v715_v42  ;;  %v718_v46 = vand.u32 2147483647, %v1689_v60  ;;  %v1692_v3 = vadd.f32 -3.0, %v623_v7 }
 0x21a   :  { %v1123_v59 = vpop.f32.mrf.mxu1  ;;  %v702_v20 = vmax.f32 %v1689_v60, 0.0 }
 0x21b   :  { %1221 = vpow2.f32 %v751_v28  ;;  %v747_v13 = vmul.f32 1.442695, %v731_v30  ;;  %v734_v56 = vsub.f32 0.0, %v718_v46  ;;  %v1694_v25 = vadd.f32 -3.0, %v1123_v59 }
 0x21c   :  { %v716_v49 = vand.u32 2147483647, %v1692_v3  ;;  %v636_v62 = vpop.f32.mrf.mxu1  ;;  %v700_v63 = vmax.f32 %v1692_v3, 0.0 }
 0x21d   :  { %1223 = vpow2.f32 %v747_v13  ;;  %v753_v43 = vmul.f32 1.442695, %v734_v56  ;;  %v721_v24 = vand.u32 2147483647, %v1694_v25  ;;  %v1698_v55 = vadd.f32 -3.0, %v636_v62 }
 0x21e   :  { %v732_v40 = vsub.f32 0.0, %v716_v49  ;;  %v1124_v19 = vpop.f32.mrf.mxu1  ;;  %v705_v45 = vmax.f32 %v1694_v25, 0.0 }
 0x21f   :  { %1225 = vpow2.f32 %v753_v43  ;;  %v737_v37 = vsub.f32 0.0, %v721_v24  ;;  %v1700_v33 = vadd.f32 -3.0, %v1124_v19  ;;  %v719_v27 = vand.u32 2147483647, %v1698_v55 }
 0x220   :  { %v749_v52 = vmul.f32 1.442695, %v732_v40  ;;  %v639_v58 = vpop.f32.mrf.mxu1  ;;  %v703_v46 = vmax.f32 %v1698_v55, 0.0 }
 0x221   :  { %v759_v14 = vmul.f32 1.442695, %v737_v37  ;;  %v722_v31 = vand.u32 2147483647, %v1700_v33  ;;  %v1704_v1 = vadd.f32 -3.0, %v639_v58  ;;  %v735_v61 = vsub.f32 0.0, %v719_v27 }
 0x222   :  { %1227 = vpow2.f32 %v749_v52  ;;  %v1127_v53 = vpop.f32.mrf.mxu1  ;;  %v706_v49 = vmax.f32 %v1700_v33, 0.0 }
 0x223   :  { %1229 = vpow2.f32 %v759_v14  ;;  %v738_v22 = vsub.f32 0.0, %v722_v31  ;;  %v720_v15 = vand.u32 2147483647, %v1704_v1  ;;  %v755_v18 = vmul.f32 1.442695, %v735_v61 }
 0x224   :  { %v1707_v32 = vadd.f32 -3.0, %v1127_v53  ;;  %v652_v54 = vpop.f32.mrf.mxu1  ;;  %v704_v62 = vmax.f32 %v1704_v1, 0.0 }
 0x225   :  { %v761_v10 = vmul.f32 1.442695, %v738_v22  ;;  %v736_v4 = vsub.f32 0.0, %v720_v15  ;;  %v1709_v11 = vadd.f32 -3.0, %v652_v54  ;;  %1231 = vpow2.f32 %v755_v18 }
 0x226   :  { %v725_v17 = vand.u32 2147483647, %v1707_v32  ;;  %v1128_v5 = vpop.f32.mrf.mxu1  ;;  %v709_v33 = vmax.f32 %v1707_v32, 0.0 }
 0x227   :  { %1233 = vpow2.f32 %v761_v10  ;;  %v757_v12 = vmul.f32 1.442695, %v736_v4  ;;  %v723_v47 = vand.u32 2147483647, %v1709_v11  ;;  %v1713_v36 = vadd.f32 -3.0, %v1128_v5 }
 0x228   :  { %v1222_v0 = vpop.eup %1221  ;;  %v741_v26 = vsub.f32 0.0, %v725_v17  ;;  %v655_v59 = vpop.f32.mrf.mxu1 }
 0x229   :  { %v797_v51 = vadd.f32 1.0, %v1222_v0  ;;  %1235 = vpow2.f32 %v757_v12  ;;  %v800_v29 = vmul.f32 -0.5, %v1222_v0  ;;  %v739_v38 = vsub.f32 0.0, %v723_v47 }
 0x22a   :  { %v1224_v41 = vpop.eup %1223  ;;  %v767_v16 = vmul.f32 1.442695, %v741_v26  ;;  %v803_v8 = vand.u32 2147483647, %v1222_v0  ;;  %v726_v35 = vand.u32 2147483647, %v1713_v36 }
 0x22b   :  { %1237 = vlog2.f32 %v797_v51  ;;  %v779_v21 = vadd.f32 1.0, %v1224_v41  ;;  %v763_v9 = vmul.f32 1.442695, %v739_v38  ;;  %v801_v6 = vadd.f32 1.0, %v800_v29 }
 0x22c   :  { %v1226_v57 = vpop.eup %1225  ;;  %1239 = vpow2.f32 %v767_v16  ;;  %v782_v39 = vmul.f32 -0.5, %v1224_v41  ;;  %v785_v13 = vand.u32 2147483647, %v1224_v41  ;;  %vm1724_vm0 = vcmp.lt.f32.partialorder %v803_v8, 0.0004427343 }
 0x22d   :  { %1241 = vlog2.f32 %v779_v21  ;;  %v806_v23 = vadd.f32 1.0, %v1226_v57  ;;  %v809_v7 = vmul.f32 -0.5, %v1226_v57  ;;  %v802_v43 = vmul.f32 %v1222_v0, %v801_v6 }
 0x22e   :  { %1243 = vpow2.f32 %v763_v9  ;;  %v783_v40 = vadd.f32 1.0, %v782_v39  ;;  %v812_v37 = vand.u32 2147483647, %v1226_v57  ;;  %v742_v52 = vsub.f32 0.0, %v726_v35 }
 0x22f   :  { %v1228_v2 = vpop.eup %1227  ;;  %1245 = vlog2.f32 %v806_v23  ;;  %v1728_v27 = vadd.f32 -3.0, %v655_v59  ;;  %v810_v14 = vadd.f32 1.0, %v809_v7  ;;  %vm1730_vm1 = vcmp.lt.f32.partialorder %v785_v13, 0.0004427343 }
 0x230   :  { %v1230_v42 = vpop.eup %1229  ;;  %v788_v28 = vadd.f32 1.0, %v1228_v2  ;;  %v791_v30 = vmul.f32 -0.5, %v1228_v2  ;;  %v794_v15 = vand.u32 2147483647, %v1228_v2  ;;  %v784_v4 = vmul.f32 %v1224_v41, %v783_v40 }
 0x231   :  { %v833_v56 = vadd.f32 1.0, %v1230_v42  ;;  %v836_v61 = vmul.f32 -0.5, %v1230_v42  ;;  %v839_v17 = vand.u32 2147483647, %v1230_v42  ;;  %v769_v0 = vmul.f32 1.442695, %v742_v52 }
 0x232   :  { %1247 = vlog2.f32 %v788_v28  ;;  %v1232_v19 = vpop.eup %1231  ;;  %v792_v31 = vadd.f32 1.0, %v791_v30  ;;  %v724_v26 = vand.u32 2147483647, %v1728_v27  ;;  %v811_v51 = vmul.f32 %v1226_v57, %v810_v14  ;;  %v1131_v28 = vpop.f32.mrf.mxu1 }
 0x233   :  { %1249 = vlog2.f32 %v833_v56  ;;  %v815_v53 = vadd.f32 1.0, %v1232_v19  ;;  %v818_v18 = vmul.f32 -0.5, %v1232_v19  ;;  %vm1738_vm2 = vcmp.lt.f32.partialorder %v812_v37, 0.0004427343 }
 0x234   :  { %v1234_v58 = vpop.eup %1233  ;;  %v793_v16 = vmul.f32 %v1228_v2, %v792_v31  ;;  %v837_v38 = vadd.f32 1.0, %v836_v61  ;;  %vm1744_vm3 = vcmp.lt.f32.partialorder %v794_v15, 0.0004427343  ;;  %v821_v6 = vand.u32 2147483647, %v1232_v19 }
 0x235   :  { %v842_v54 = vadd.f32 1.0, %v1234_v58  ;;  %1251 = vlog2.f32 %v815_v53  ;;  %v845_v12 = vmul.f32 -0.5, %v1234_v58  ;;  %v819_v23 = vadd.f32 1.0, %v818_v18  ;;  %v668_v18 = vpop.f32.mrf.mxu1 }
 0x236   :  { %v1734_v10 = vpop.eup %1235  ;;  %vm1748_vm4 = vcmp.lt.f32.partialorder %v839_v17, 0.0004427343  ;;  %v848_v35 = vand.u32 2147483647, %v1234_v58  ;;  %v740_v56 = vsub.f32 0.0, %v724_v26  ;;  %v838_v52 = vmul.f32 %v1230_v42, %v837_v38 }
 0x237   :  { %1253 = vlog2.f32 %v842_v54  ;;  %v824_v47 = vadd.f32 1.0, %v1734_v10  ;;  %v846_v57 = vadd.f32 1.0, %v845_v12  ;;  %v827_v2 = vmul.f32 -0.5, %v1734_v10  ;;  %v1132_v60 = vpop.f32.mrf.mxu1 }
 0x238   :  { %v1238_v5 = vpop.eup %1237  ;;  %v830_v14 = vand.u32 2147483647, %v1734_v10  ;;  %v820_v53 = vmul.f32 %v1232_v19, %v819_v23  ;;  %vm1763_vm5 = vcmp.lt.f32.partialorder %v821_v6, 0.0004427343  ;;  %vm1770_vm6 = vcmp.lt.f32.partialorder %v848_v35, 0.0004427343 }
 0x239   :  { %v1742_v21 = vpop.eup %1239  ;;  %v799_v41 = vmul.f32 0.6931472, %v1238_v5  ;;  %1255 = vlog2.f32 %v824_v47  ;;  %v765_v17 = vmul.f32 1.442695, %v740_v56  ;;  %v1784_v5 = vadd.f32 -3.0, %v1131_v28 }
 0x23a   :  { %v1242_v8 = vpop.eup %1241  ;;  %v869_v7 = vadd.f32 1.0, %v1742_v21  ;;  %1257 = vpow2.f32 %v769_v0  ;;  %v872_v22 = vmul.f32 -0.5, %v1742_v21  ;;  %vm1779_vm7 = vcmp.lt.f32.partialorder %v830_v14, 0.0004427343  ;;  %v671_v14 = vpop.f32.mrf.mxu1 }
 0x23b   :  { %v1754_v30 = vpop.eup %1243  ;;  %v805_v59 = vsel %vm1724_vm0, %v802_v43, %v799_v41  ;;  %v781_v13 = vmul.f32 0.6931472, %v1242_v8  ;;  %v875_v26 = vand.u32 2147483647, %v1742_v21  ;;  %v1788_v41 = vadd.f32 -3.0, %v668_v18 }
 0x23c   :  { %v1246_v40 = vpop.eup %1245  ;;  %v925_v37 = vadd.f32 %v805_v59, %v701_v50  ;;  %1259 = vlog2.f32 %v869_v7  ;;  %v851_v43 = vadd.f32 1.0, %v1754_v30  ;;  %v847_v50 = vmul.f32 %v1234_v58, %v846_v57 }
 0x23d   :  { %v787_v31 = vsel %vm1730_vm1, %v784_v4, %v781_v13  ;;  %v808_v61 = vmul.f32 0.6931472, %v1246_v40  ;;  %v828_v4 = vadd.f32 1.0, %v827_v2  ;;  %v873_v38 = vadd.f32 1.0, %v872_v22 }
 0x23e   :  { %v941_v24 = vmul.f32 0.1, %v925_v37  ;;  %v923_v48 = vadd.f32 %v787_v31, %v699_v34  ;;  %1261 = vlog2.f32 %v851_v43  ;;  %v729_v57 = vand.u32 2147483647, %v1784_v5 }
 0x23f   :  { %v1248_v54 = vpop.eup %1247  ;;  %v814_v19 = vsel %vm1738_vm2, %v811_v51, %v808_v61  ;;  %1263 = vpow2.f32 %v765_v17  ;;  %v829_v8 = vmul.f32 %v1734_v10, %v828_v4  ;;  %v854_v2 = vmul.f32 -0.5, %v1754_v30 }
 0x240   :  { %v1250_v12 = vpop.eup %1249  ;;  %957 = vst [vmem:[#allocation8 + $0x10] sm:$0xff] %v941_v24  ;;  %v939_v47 = vmul.f32 0.1, %v923_v48  ;;  %v926_v44 = vadd.f32 %v814_v19, %v702_v20  ;;  %v790_v34 = vmul.f32 0.6931472, %v1248_v54  ;;  %v1800_v59 = vadd.f32 -3.0, %v1132_v60 }
 0x241   :  { %v835_v0 = vmul.f32 0.6931472, %v1250_v12  ;;  %v727_v7 = vand.u32 2147483647, %v1788_v41  ;;  %v874_v56 = vmul.f32 %v1742_v21, %v873_v38  ;;  %v1817_v18 = vadd.f32 -3.0, %v671_v14 }
 0x242   :  { %955 = vst [vmem:[#allocation8] sm:$0xff] %v939_v47  ;;  %v942_v51 = vmul.f32 0.1, %v926_v44  ;;  %v796_v29 = vsel %vm1744_vm3, %v793_v16, %v790_v34  ;;  %v1252_v20 = vpop.eup %1251  ;;  %v730_v21 = vand.u32 2147483647, %v1800_v59  ;;  %v707_v17 = vmax.f32 %v1709_v11, 0.0 }
 0x243   :  { %v924_v23 = vadd.f32 %v796_v29, %v700_v63  ;;  %v841_v6 = vsel %vm1748_vm4, %v838_v52, %v835_v0  ;;  %v817_v9 = vmul.f32 0.6931472, %v1252_v20  ;;  %v745_v63 = vsub.f32 0.0, %v729_v57 }
 0x244   :  { %v1254_v35 = vpop.eup %1253  ;;  %958 = vst [vmem:[#allocation8 + $0x18] sm:$0xff] %v942_v51  ;;  %v929_v16 = vadd.f32 %v841_v6, %v705_v45  ;;  %v743_v40 = vsub.f32 0.0, %v727_v7  ;;  %v857_v52 = vand.u32 2147483647, %v1754_v30  ;;  %vm876_vm8 = vcmp.lt.f32.partialorder %v875_v26, 0.0004427343 }
 0x245   :  { %v940_v28 = vmul.f32 0.1, %v924_v23  ;;  %v844_v3 = vmul.f32 0.6931472, %v1254_v35  ;;  %v823_v10 = vsel %vm1763_vm5, %v820_v53, %v817_v9  ;;  %v855_v53 = vadd.f32 1.0, %v854_v2 }
 0x246   :  { %v1256_v39 = vpop.eup %1255  ;;  %v945_v13 = vmul.f32 0.1, %v929_v16  ;;  %v927_v25 = vadd.f32 %v823_v10, %v703_v46  ;;  %v775_v15 = vmul.f32 1.442695, %v745_v63  ;;  %v771_v48 = vmul.f32 1.442695, %v743_v40 }
 0x247   :  { %956 = vst [vmem:[#allocation8 + $0x8] sm:$0xff] %v940_v28  ;;  %v850_v45 = vsel %vm1770_vm6, %v847_v50, %v844_v3  ;;  %v826_v37 = vmul.f32 0.6931472, %v1256_v39  ;;  %v1258_v31 = vpop.eup %1257  ;;  %v856_v1 = vmul.f32 %v1754_v30, %v855_v53  ;;  %vm858_vm9 = vcmp.lt.f32.partialorder %v857_v52, 0.0004427343 }
 0x248   :  { %961 = vst [vmem:[#allocation8 + $0x30] sm:$0xff] %v945_v13  ;;  %v930_v61 = vadd.f32 %v850_v45, %v706_v49  ;;  %v943_v24 = vmul.f32 0.1, %v927_v25  ;;  %v878_v46 = vadd.f32 1.0, %v1258_v31  ;;  %v746_v49 = vsub.f32 0.0, %v730_v21 }
 0x249   :  { %v1260_v43 = vpop.eup %1259  ;;  %v832_v55 = vsel %vm1779_vm7, %v829_v8, %v826_v37  ;;  %v728_v32 = vand.u32 2147483647, %v1817_v18  ;;  %v881_v11 = vmul.f32 -0.5, %v1258_v31  ;;  %v884_v60 = vand.u32 2147483647, %v1258_v31 }
 0x24a   :  { %v946_v50 = vmul.f32 0.1, %v930_v61  ;;  %v928_v42 = vadd.f32 %v832_v55, %v704_v62  ;;  %v871_v22 = vmul.f32 0.6931472, %v1260_v43  ;;  %959 = vst [vmem:[#allocation8 + $0x20] sm:$0xff] %v943_v24  ;;  %1265 = vlog2.f32 %v878_v46 }
 0x24b   :  { %v1262_v54 = vpop.eup %1261  ;;  %1267 = vpow2.f32 %v775_v15  ;;  %v777_v44 = vmul.f32 1.442695, %v746_v49  ;;  %v744_v51 = vsub.f32 0.0, %v728_v32  ;;  %v882_v30 = vadd.f32 1.0, %v881_v11 }
 0x24c   :  { %962 = vst [vmem:[#allocation8 + $0x38] sm:$0xff] %v946_v50  ;;  %v944_v19 = vmul.f32 0.1, %v928_v42  ;;  %v877_v4 = vsel %vm876_vm8, %v874_v56, %v871_v22  ;;  %v853_v47 = vmul.f32 0.6931472, %v1262_v54  ;;  %1269 = vpow2.f32 %v771_v48  ;;  %v1264_v62 = vpop.eup %1263 }
 0x24d   :  { %v933_v12 = vadd.f32 %v877_v4, %v709_v33  ;;  %v860_v0 = vadd.f32 1.0, %v1264_v62  ;;  %1271 = vpow2.f32 %v777_v44  ;;  %v773_v38 = vmul.f32 1.442695, %v744_v51 }
 0x24e   :  { %960 = vst [vmem:[#allocation8 + $0x28] sm:$0xff] %v944_v19  ;;  %v859_v58 = vsel %vm858_vm9, %v856_v1, %v853_v47  ;;  %v863_v20 = vmul.f32 -0.5, %v1264_v62  ;;  %v883_v57 = vmul.f32 %v1258_v31, %v882_v30  ;;  %v710_v16 = vmax.f32 %v1713_v36, 0.0 }
 0x24f   :  { %v949_v34 = vmul.f32 0.1, %v933_v12  ;;  %v931_v26 = vadd.f32 %v859_v58, %v707_v17  ;;  %1273 = vlog2.f32 %v860_v0  ;;  %vm885_vm10 = vcmp.lt.f32.partialorder %v884_v60, 0.0004427343 }
 0x250   :  { %1275 = vpow2.f32 %v773_v38  ;;  %v864_v7 = vadd.f32 1.0, %v863_v20  ;;  %v866_v63 = vand.u32 2147483647, %v1264_v62  ;;  %v708_v45 = vmax.f32 %v1728_v27, 0.0 }
 0x251   :  { %965 = vst [vmem:[#allocation8 + $0x50] sm:$0xff] %v949_v34  ;;  %v947_v29 = vmul.f32 0.1, %v931_v26  ;;  %v713_v48 = vmax.f32 %v1784_v5, 0.0  ;;  %v711_v17 = vmax.f32 %v1788_v41, 0.0  ;;  %v712_v60 = vmax.f32 %v1817_v18, 0.0 }
 0x252   :  { %v865_v25 = vmul.f32 %v1264_v62, %v864_v7  ;;  %vm867_vm11 = vcmp.lt.f32.partialorder %v866_v63, 0.0004427343  ;;  %v714_v62 = vmax.f32 %v1800_v59, 0.0 }
 0x253   :  { %963 = vst [vmem:[#allocation8 + $0x40] sm:$0xff] %v947_v29 }
 0x257   :  { %v1266_v23 = vpop.eup %1265 }
 0x258   :  { %v1268_v6 = vpop.eup %1267  ;;  %v880_v8 = vmul.f32 0.6931472, %v1266_v23 }
 0x259   :  { %v1270_v35 = vpop.eup %1269  ;;  %v905_v9 = vadd.f32 1.0, %v1268_v6  ;;  %v908_v14 = vmul.f32 -0.5, %v1268_v6  ;;  %v911_v43 = vand.u32 2147483647, %v1268_v6 }
 0x25a   :  { %v886_v2 = vsel %vm885_vm10, %v883_v57, %v880_v8  ;;  %v887_v28 = vadd.f32 1.0, %v1270_v35  ;;  %v1272_v39 = vpop.eup %1271  ;;  %v890_v61 = vmul.f32 -0.5, %v1270_v35  ;;  %v893_v55 = vand.u32 2147483647, %v1270_v35 }
 0x25b   :  { %v934_v3 = vadd.f32 %v886_v2, %v710_v16  ;;  %1277 = vlog2.f32 %v905_v9  ;;  %v914_v56 = vadd.f32 1.0, %v1272_v39  ;;  %v909_v15 = vadd.f32 1.0, %v908_v14 }
 0x25c   :  { %1279 = vlog2.f32 %v887_v28  ;;  %v1274_v13 = vpop.eup %1273  ;;  %v917_v21 = vmul.f32 -0.5, %v1272_v39  ;;  %v891_v24 = vadd.f32 1.0, %v890_v61  ;;  %vm912_vm12 = vcmp.lt.f32.partialorder %v911_v43, 0.0004427343 }
 0x25d   :  { %v950_v10 = vmul.f32 0.1, %v934_v3  ;;  %v862_v40 = vmul.f32 0.6931472, %v1274_v13  ;;  %1281 = vlog2.f32 %v914_v56  ;;  %v1276_v36 = vpop.eup %1275  ;;  %v910_v42 = vmul.f32 %v1268_v6, %v909_v15 }
 0x25e   :  { %v896_v31 = vadd.f32 1.0, %v1276_v36  ;;  %v918_v22 = vadd.f32 1.0, %v917_v21  ;;  %v899_v33 = vmul.f32 -0.5, %v1276_v36  ;;  %v892_v54 = vmul.f32 %v1270_v35, %v891_v24 }
 0x25f   :  { %966 = vst [vmem:[#allocation8 + $0x58] sm:$0xff] %v950_v10  ;;  %v868_v37 = vsel %vm867_vm11, %v865_v25, %v862_v40  ;;  %v920_v19 = vand.u32 2147483647, %v1272_v39  ;;  %vm894_vm13 = vcmp.lt.f32.partialorder %v893_v55, 0.0004427343 }
 0x260   :  { %v932_v52 = vadd.f32 %v868_v37, %v708_v45  ;;  %1283 = vlog2.f32 %v896_v31  ;;  %v919_v32 = vmul.f32 %v1272_v39, %v918_v22  ;;  %v900_v34 = vadd.f32 1.0, %v899_v33 }
 0x261   :  { %vm921_vm14 = vcmp.lt.f32.partialorder %v920_v19, 0.0004427343  ;;  %v902_v0 = vand.u32 2147483647, %v1276_v36 }
 0x262   :  { %v948_v53 = vmul.f32 0.1, %v932_v52  ;;  %v901_v38 = vmul.f32 %v1276_v36, %v900_v34 }
 0x263   :  { %vm903_vm15 = vcmp.lt.f32.partialorder %v902_v0, 0.0004427343 }
 0x264   :  { %964 = vst [vmem:[#allocation8 + $0x48] sm:$0xff] %v948_v53 }
 0x268   :  { %v1278_v46 = vpop.eup %1277 }
 0x269   :  { %v1280_v27 = vpop.eup %1279  ;;  %v907_v50 = vmul.f32 0.6931472, %v1278_v46 }
 0x26a   :  { %v889_v49 = vmul.f32 0.6931472, %v1280_v27  ;;  %v1282_v12 = vpop.eup %1281 }
 0x26b   :  { %v913_v4 = vsel %vm912_vm12, %v910_v42, %v907_v50  ;;  %v916_v5 = vmul.f32 0.6931472, %v1282_v12 }
 0x26c   :  { %v937_v47 = vadd.f32 %v913_v4, %v713_v48  ;;  %v895_v1 = vsel %vm894_vm13, %v892_v54, %v889_v49 }
 0x26d   :  { %v935_v44 = vadd.f32 %v895_v1, %v711_v17  ;;  %v922_v51 = vsel %vm921_vm14, %v919_v32, %v916_v5  ;;  %v1284_v11 = vpop.eup %1283 }
 0x26e   :  { %v953_v58 = vmul.f32 0.1, %v937_v47  ;;  %v938_v29 = vadd.f32 %v922_v51, %v714_v62  ;;  %v898_v41 = vmul.f32 0.6931472, %v1284_v11 }
 0x26f   :  { %v951_v26 = vmul.f32 0.1, %v935_v44 }
 0x270   :  { %969 = vst [vmem:[#allocation8 + $0x70] sm:$0xff] %v953_v58  ;;  %v954_v30 = vmul.f32 0.1, %v938_v29  ;;  %v904_v59 = vsel %vm903_vm15, %v901_v38, %v898_v41 }
 0x271   :  { %967 = vst [vmem:[#allocation8 + $0x60] sm:$0xff] %v951_v26  ;;  %v936_v20 = vadd.f32 %v904_v59, %v712_v60 }
 0x272   :  { %970 = vst [vmem:[#allocation8 + $0x78] sm:$0xff] %v954_v30 }
 0x273   :  { %v952_v23 = vmul.f32 0.1, %v936_v20 }
 0x275   :  { %968 = vst [vmem:[#allocation8 + $0x68] sm:$0xff] %v952_v23 }
 0x276   :  { %1356 = shalt.err (!%p1353_p5)
}
 0x277   :  { %982 = dma.vmem_to_hbm [thread:$0]  %s977_s2, 2048, %s1838_s3, [#allocation4], %s1375_s22, %s1375_s22, %s1376_s23  }
 0x278   :  { %1369 = dma.done.wait [#allocation4], 2048  }
 0x279   :  { %1370 = vsyncadd [#allocation4], 4294965248 }
 0x27a   :  { %986 = vsyncpa [#allocation3], 1 }
 0x27b   :  { %987 = vsyncpa [#allocation6], 1 }
 0x27c   :  { %988 = vsyncpa [#allocation4], 1 }

</bundles_post_ra>
